<compile_context>
chip_gen: v6e
topology: v6e:2x2x1
jax: 0.10.0
libtpu: 0.0.40
codegen_flags: <defaults>
</compile_context>

<pallas_src>
import functools

import jax
import jax.numpy as jnp
from jax import lax
from jax.experimental import pallas as pl
from jax.experimental.pallas import tpu as pltpu


# ----------------------------------------------------------------------------
# In-kernel helper: one 3x3 conv (pad=1) + folded-BN + optional ReLU on a
# lane-packed activation (M = nb*H rows, lanes = c*W + w).
#   xs       : (M, Cin*W) f32
#   mask_top : (M, 1) bool  -- row has a valid row above it (dy = -1 tap)
#   mask_bot : (M, 1) bool  -- row has a valid row below it (dy = +1 tap)
#   w_ref    : (3, Cin*W, Cout*W) banded per-tap weights (BN scale folded in;
#              the W-direction zero padding is encoded in the band structure)
#   b_ref    : (1, Cout*W) folded bias
# ----------------------------------------------------------------------------
def _conv_stage(xs, mask_top, mask_bot, w_ref, b_ref, relu):
    m = xs.shape[0]
    cout_w = w_ref.shape[2]

    # dy = -1 / +1 shifted views via sublane rotate (XLU) + zero-mask at the
    # image boundaries (also kills the wrap row of the rotation).
    up = jnp.where(mask_top, pltpu.roll(xs, shift=1, axis=0), 0.0)
    down = jnp.where(mask_bot, pltpu.roll(xs, shift=m - 1, axis=0), 0.0)

    acc = jnp.broadcast_to(b_ref[...], (m, cout_w))
    acc = acc + jnp.dot(up, w_ref[0], preferred_element_type=jnp.float32)
    acc = acc + jnp.dot(xs, w_ref[1], preferred_element_type=jnp.float32)
    acc = acc + jnp.dot(down, w_ref[2], preferred_element_type=jnp.float32)
    if relu:
        acc = jnp.maximum(acc, 0.0)
    return acc


# ----------------------------------------------------------------------------
# Fused kernel: conv1+BN1+ReLU -> conv2+BN2+ReLU -> store.
# Each grid step handles nb full (H, W) images; the intermediate activation
# never leaves VMEM/vregs.
# ----------------------------------------------------------------------------
def _double_conv_cat_kernel(x_ref, w1_ref, b1_ref, w2_ref, b2_ref, o_ref,
                            *, H, relu):
    nb = x_ref.shape[0]
    m = nb * H
    cin_w = x_ref.shape[2]
    cout_w = w2_ref.shape[2]

    # Lane-dense load; stack the nb images along sublanes (layout-trivial since
    # H is a multiple of 8).
    xs = x_ref[...].reshape(m, cin_w).astype(jnp.float32)

    # Row masks shared by both conv stages (image-boundary zero padding in H).
    rows = lax.broadcasted_iota(jnp.int32, (m, 1), 0)
    mask_top = (rows % H) != 0
    mask_bot = (rows % H) != (H - 1)

    y1 = _conv_stage(xs, mask_top, mask_bot, w1_ref, b1_ref, relu)
    y2 = _conv_stage(y1, mask_top, mask_bot, w2_ref, b2_ref, relu)

    # Lane-dense store: (nb, H, Cout*W) -- 128 lanes wide at the test shapes.
    o_ref[...] = y2.reshape(nb, H, cout_w).astype(o_ref.dtype)


# ----------------------------------------------------------------------------
# Wrapper-side parameter preparation.
# ----------------------------------------------------------------------------
def _fold_bn(conv_bias, gamma, beta, mean, var, eps=1e-5):
    scale = gamma * lax.rsqrt(var + eps)
    bias = (conv_bias - mean) * scale + beta
    return scale, bias


def _build_banded_weight(w_hwio, scale, W):
    """Per-tap banded im2col weight (3, Cin*W, Cout*W) with BN scale folded in.

    For tap ky, row index = c*W + wi, col index = co*W + w; nonzero iff
    wi == w + kx - 1 for some kx in {0,1,2} and 0 <= wi < W (so the W-boundary
    zero padding is encoded by the missing band entries).
    """
    cin, cout = w_hwio.shape[2], w_hwio.shape[3]
    ws = (w_hwio * scale).astype(jnp.float32)                 # fold BN scale
    # S[kx, wi, w] = 1 iff wi == w + kx - 1  (in range)
    shift = jnp.stack([jnp.eye(W, k=1 - kx, dtype=jnp.float32) for kx in range(3)])
    band = jnp.einsum('yxio,xuw->yiuow', ws, shift)           # (3, Cin, W, Cout, W)
    return band.reshape(3, cin * W, cout * W)


def make_params(key, in_channels, out_channels, mid_channels=None):
    if mid_channels is None:
        mid_channels = out_channels
    cin = in_channels * 2  # DoubleConvCat concatenates two inputs along channels
    k1, k2 = jax.random.split(key)

    def conv_layer(k, cin_, cout_):
        kw, kb, kg, kbe, km, kv = jax.random.split(k, 6)
        return dict(
            w=0.1 * jax.random.normal(kw, (3, 3, cin_, cout_), jnp.float32),
            b=0.05 * jax.random.normal(kb, (cout_,), jnp.float32),
            gamma=1.0 + 0.1 * jax.random.normal(kg, (cout_,), jnp.float32),
            beta=0.1 * jax.random.normal(kbe, (cout_,), jnp.float32),
            mean=0.1 * jax.random.normal(km, (cout_,), jnp.float32),
            var=jnp.abs(jax.random.normal(kv, (cout_,), jnp.float32)) + 0.5,
        )

    return conv_layer(k1, cin, mid_channels), conv_layer(k2, mid_channels, out_channels)


def _pick_nb(N, H, target_rows=128):
    """Images per grid step: grow M = nb*H toward ~128 MXU rows, but keep at
    least 2 grid steps whenever N >= 2 so v7x's two TensorCores both get work."""
    nb = 1
    for cand in range(1, N + 1):
        if N % cand != 0:
            continue
        if N >= 2 and N // cand < 2:
            continue
        if cand * H <= target_rows:
            nb = cand
    return nb


# ----------------------------------------------------------------------------
# DoubleConvCat forward (NCHW in / NCHW out, matching the PyTorch module).
# ----------------------------------------------------------------------------
def double_conv_cat(x1_nchw, x2_nchw, params, *, linear=False):
    p1, p2 = params
    N, C, H, W = x1_nchw.shape
    cin = 2 * C
    cmid = p1["w"].shape[-1]
    cout = p2["w"].shape[-1]

    s1, b1 = _fold_bn(p1["b"], p1["gamma"], p1["beta"], p1["mean"], p1["var"])
    s2, b2 = _fold_bn(p2["b"], p2["gamma"], p2["beta"], p2["mean"], p2["var"])

    w1b = _build_banded_weight(p1["w"], s1, W)                 # (3, cin*W, cmid*W)
    w2b = _build_banded_weight(p2["w"], s2, W)                 # (3, cmid*W, cout*W)
    b1r = jnp.repeat(b1, W).reshape(1, cmid * W).astype(jnp.float32)
    b2r = jnp.repeat(b2, W).reshape(1, cout * W).astype(jnp.float32)

    # Lane-dense packed input: concat channels + pack lanes (lane = c*W + w) in
    # the wrapper (tiny XLA transpose) instead of masked 16-lane loads in-kernel.
    xcat = jnp.concatenate([x1_nchw, x2_nchw], axis=1)         # (N, 2C, H, W)
    x_packed = jnp.transpose(xcat, (0, 2, 1, 3)).reshape(N, H, cin * W)

    nb = _pick_nb(N, H)
    grid = (N // nb,)

    kernel = functools.partial(_double_conv_cat_kernel, H=H, relu=not linear)

    out_packed = pl.pallas_call(
        kernel,
        out_shape=jax.ShapeDtypeStruct((N, H, cout * W), x1_nchw.dtype),
        grid_spec=pltpu.PrefetchScalarGridSpec(
            num_scalar_prefetch=0,
            grid=grid,
            in_specs=[
                pl.BlockSpec((nb, H, cin * W), lambda n: (n, 0, 0)),          # x packed
                pl.BlockSpec((3, cin * W, cmid * W), lambda n: (0, 0, 0)),    # w1 band
                pl.BlockSpec((1, cmid * W), lambda n: (0, 0)),                # b1
                pl.BlockSpec((3, cmid * W, cout * W), lambda n: (0, 0, 0)),   # w2 band
                pl.BlockSpec((1, cout * W), lambda n: (0, 0)),                # b2
            ],
            out_specs=pl.BlockSpec((nb, H, cout * W), lambda n: (n, 0, 0)),
        ),
        compiler_params=pltpu.CompilerParams(
            dimension_semantics=("parallel",),
            vmem_limit_bytes=32 * 1024 * 1024,
        ),
    )(x_packed, w1b, b1r, w2b, b2r)

    # packed lane index = co*W + w  ->  NCHW (small output-side transpose only).
    # TODO(synk): skip this unpack when the consumer accepts the packed layout.
    out = out_packed.reshape(N, H, cout, W)
    return jnp.transpose(out, (0, 2, 1, 3))


# ----------------------------------------------------------------------------
# Pure-JAX reference (for correctness check).
# ----------------------------------------------------------------------------
def _ref_layer(x_nhwc, p, relu, eps=1e-5):
    y = lax.conv_general_dilated(
        x_nhwc, p["w"], window_strides=(1, 1), padding="SAME",
        dimension_numbers=("NHWC", "HWIO", "NHWC"),
    ) + p["b"]
    y = (y - p["mean"]) / jnp.sqrt(p["var"] + eps) * p["gamma"] + p["beta"]
    return jnp.maximum(y, 0.0) if relu else y


def double_conv_cat_ref(x1_nchw, x2_nchw, params, *, linear=False):
    p1, p2 = params
    x = jnp.concatenate([x1_nchw, x2_nchw], axis=1)
    x = jnp.transpose(x, (0, 2, 3, 1))
    y = _ref_layer(x, p1, not linear)
    y = _ref_layer(y, p2, not linear)
    return jnp.transpose(y, (0, 3, 1, 2))


if __name__ == "__main__":
    key = jax.random.PRNGKey(0)
    k1, k2, kp = jax.random.split(key, 3)

    N, C, H, W = 2, 4, 16, 16          # per-branch channels = 4 (NCHW)
    out_channels = 8                   # concat channels = 8, mid = out = 8

    x1 = jax.random.normal(k1, (N, C, H, W), jnp.float32)
    x2 = jax.random.normal(k2, (N, C, H, W), jnp.float32)

    params = make_params(kp, in_channels=C, out_channels=out_channels)

    out = jax.block_until_ready(double_conv_cat(x1, x2, params))
    ref = jax.block_until_ready(double_conv_cat_ref(x1, x2, params))

    assert out.shape == (N, out_channels, H, W), out.shape
    max_err = float(jnp.max(jnp.abs(out - ref)))
    assert max_err < 1e-3, max_err

    print("KERNEL_OK")
</pallas_src>

<mosaic_0001>
module attributes {stable_mosaic.version = 11 : i64} {
  func.func @_double_conv_cat_kernel(%arg0: i32, %arg1: memref<1x16x128xf32, #tpu.memory_space<vmem>>, %arg2: memref<3x128x128xf32, #tpu.memory_space<vmem>>, %arg3: memref<1x128xf32, #tpu.memory_space<vmem>>, %arg4: memref<3x128x128xf32, #tpu.memory_space<vmem>>, %arg5: memref<1x128xf32, #tpu.memory_space<vmem>>, %arg6: memref<1x16x128xf32, #tpu.memory_space<vmem>>) attributes {dimension_semantics = [#tpu.dimension_semantics<parallel>], iteration_bounds = array<i64: 2>, scalar_prefetch = 0 : i64, scratch_operands = 0 : i64, tpu.core_type = #tpu.core_type<tc>, window_params = [{transform_indices = @transform_0, window_bounds = array<i64: 1, 16, 128>}, {pipeline_mode = #tpu.pipeline_mode<synchronous>, transform_indices = @transform_1, window_bounds = array<i64: 3, 128, 128>}, {pipeline_mode = #tpu.pipeline_mode<synchronous>, transform_indices = @transform_2, window_bounds = array<i64: 1, 128>}, {pipeline_mode = #tpu.pipeline_mode<synchronous>, transform_indices = @transform_3, window_bounds = array<i64: 3, 128, 128>}, {pipeline_mode = #tpu.pipeline_mode<synchronous>, transform_indices = @transform_4, window_bounds = array<i64: 1, 128>}, {transform_indices = @transform_5, window_bounds = array<i64: 1, 16, 128>}]} {
    %c0 = arith.constant 0 : index
    %c0_0 = arith.constant 0 : index
    %c0_1 = arith.constant 0 : index
    %0 = vector.load %arg1[%c0, %c0_0, %c0_1] : memref<1x16x128xf32, #tpu.memory_space<vmem>>, vector<1x16x128xf32>
    %1 = vector.shape_cast %0 : vector<1x16x128xf32> to vector<16x128xf32>
    %2 = tpu.iota {dimensions = array<i32: 0>} : vector<16x1xi32>
    %c16_i32 = arith.constant 16 : i32
    %c0_i32 = arith.constant 0 : i32
    %3 = arith.cmpi eq, %c16_i32, %c0_i32 : i32
    %c1_i32 = arith.constant 1 : i32
    %4 = arith.select %3, %c1_i32, %c16_i32 : i32
    %5 = vector.broadcast %4 : i32 to vector<16x1xi32>
    %6 = arith.remsi %2, %5 : vector<16x1xi32>
    %c0_i32_2 = arith.constant 0 : i32
    %7 = vector.broadcast %c0_i32_2 : i32 to vector<16x1xi32>
    %8 = arith.cmpi ne, %6, %7 : vector<16x1xi32>
    %c0_i32_3 = arith.constant 0 : i32
    %9 = vector.broadcast %c0_i32_3 : i32 to vector<16x1xi32>
    %10 = arith.cmpi slt, %6, %9 : vector<16x1xi32>
    %c0_i32_4 = arith.constant 0 : i32
    %11 = arith.cmpi slt, %4, %c0_i32_4 : i32
    %12 = vector.broadcast %11 : i1 to vector<16x1xi1>
    %13 = vector.broadcast %12 : vector<16x1xi1> to vector<16x1xi1>
    %14 = arith.xori %10, %13 : vector<16x1xi1>
    %15 = arith.andi %14, %8 : vector<16x1xi1>
    %16 = vector.broadcast %4 : i32 to vector<16x1xi32>
    %17 = arith.addi %6, %16 : vector<16x1xi32>
    %18 = arith.select %15, %17, %6 : vector<16x1xi1>, vector<16x1xi32>
    %c0_i32_5 = arith.constant 0 : i32
    %19 = vector.broadcast %c0_i32_5 : i32 to vector<16x1xi32>
    %20 = arith.cmpi ne, %18, %19 : vector<16x1xi32>
    %c16_i32_6 = arith.constant 16 : i32
    %c0_i32_7 = arith.constant 0 : i32
    %21 = arith.cmpi eq, %c16_i32_6, %c0_i32_7 : i32
    %c1_i32_8 = arith.constant 1 : i32
    %22 = arith.select %21, %c1_i32_8, %c16_i32_6 : i32
    %23 = vector.broadcast %22 : i32 to vector<16x1xi32>
    %24 = arith.remsi %2, %23 : vector<16x1xi32>
    %c0_i32_9 = arith.constant 0 : i32
    %25 = vector.broadcast %c0_i32_9 : i32 to vector<16x1xi32>
    %26 = arith.cmpi ne, %24, %25 : vector<16x1xi32>
    %c0_i32_10 = arith.constant 0 : i32
    %27 = vector.broadcast %c0_i32_10 : i32 to vector<16x1xi32>
    %28 = arith.cmpi slt, %24, %27 : vector<16x1xi32>
    %c0_i32_11 = arith.constant 0 : i32
    %29 = arith.cmpi slt, %22, %c0_i32_11 : i32
    %30 = vector.broadcast %29 : i1 to vector<16x1xi1>
    %31 = vector.broadcast %30 : vector<16x1xi1> to vector<16x1xi1>
    %32 = arith.xori %28, %31 : vector<16x1xi1>
    %33 = arith.andi %32, %26 : vector<16x1xi1>
    %34 = vector.broadcast %22 : i32 to vector<16x1xi32>
    %35 = arith.addi %24, %34 : vector<16x1xi32>
    %36 = arith.select %33, %35, %24 : vector<16x1xi1>, vector<16x1xi32>
    %c15_i32 = arith.constant 15 : i32
    %37 = vector.broadcast %c15_i32 : i32 to vector<16x1xi32>
    %38 = arith.cmpi ne, %36, %37 : vector<16x1xi32>
    %c1_i32_12 = arith.constant 1 : i32
    %39 = tpu.dynamic_rotate %1 by %c1_i32_12 dim 0 : vector<16x128xf32>, i32 -> vector<16x128xf32>
    %cst = arith.constant 0.000000e+00 : f32
    %40 = vector.shape_cast %20 : vector<16x1xi1> to vector<16x1xi1>
    %41 = vector.broadcast %40 : vector<16x1xi1> to vector<16x128xi1>
    %42 = vector.broadcast %cst : f32 to vector<16x128xf32>
    %43 = arith.select %41, %39, %42 : vector<16x128xi1>, vector<16x128xf32>
    %c15_i32_13 = arith.constant 15 : i32
    %44 = tpu.dynamic_rotate %1 by %c15_i32_13 dim 0 : vector<16x128xf32>, i32 -> vector<16x128xf32>
    %cst_14 = arith.constant 0.000000e+00 : f32
    %45 = vector.shape_cast %38 : vector<16x1xi1> to vector<16x1xi1>
    %46 = vector.broadcast %45 : vector<16x1xi1> to vector<16x128xi1>
    %47 = vector.broadcast %cst_14 : f32 to vector<16x128xf32>
    %48 = arith.select %46, %44, %47 : vector<16x128xi1>, vector<16x128xf32>
    %c0_15 = arith.constant 0 : index
    %c0_16 = arith.constant 0 : index
    %49 = vector.load %arg3[%c0_15, %c0_16] : memref<1x128xf32, #tpu.memory_space<vmem>>, vector<1x128xf32>
    %50 = vector.shape_cast %49 : vector<1x128xf32> to vector<1x128xf32>
    %51 = vector.broadcast %50 : vector<1x128xf32> to vector<16x128xf32>
    %c0_17 = arith.constant 0 : index
    %c0_18 = arith.constant 0 : index
    %c0_19 = arith.constant 0 : index
    %52 = vector.load %arg2[%c0_17, %c0_18, %c0_19] : memref<3x128x128xf32, #tpu.memory_space<vmem>>, vector<1x128x128xf32>
    %53 = vector.shape_cast %52 : vector<1x128x128xf32> to vector<128x128xf32>
    %cst_20 = arith.constant dense<0.000000e+00> : vector<16x128xf32>
    %54 = tpu.matmul %43, %53, %cst_20 {dimension_numbers = #tpu.dot_dimension_numbers<[1], [0], [0], [1], [0, 0, 1, 1], [], []>} : vector<16x128xf32>, vector<128x128xf32>, vector<16x128xf32> -> vector<16x128xf32>
    %55 = arith.addf %51, %54 : vector<16x128xf32>
    %c1 = arith.constant 1 : index
    %c0_21 = arith.constant 0 : index
    %c0_22 = arith.constant 0 : index
    %56 = vector.load %arg2[%c1, %c0_21, %c0_22] : memref<3x128x128xf32, #tpu.memory_space<vmem>>, vector<1x128x128xf32>
    %57 = vector.shape_cast %56 : vector<1x128x128xf32> to vector<128x128xf32>
    %cst_23 = arith.constant dense<0.000000e+00> : vector<16x128xf32>
    %58 = tpu.matmul %1, %57, %cst_23 {dimension_numbers = #tpu.dot_dimension_numbers<[1], [0], [0], [1], [0, 0, 1, 1], [], []>} : vector<16x128xf32>, vector<128x128xf32>, vector<16x128xf32> -> vector<16x128xf32>
    %59 = arith.addf %55, %58 : vector<16x128xf32>
    %c2 = arith.constant 2 : index
    %c0_24 = arith.constant 0 : index
    %c0_25 = arith.constant 0 : index
    %60 = vector.load %arg2[%c2, %c0_24, %c0_25] : memref<3x128x128xf32, #tpu.memory_space<vmem>>, vector<1x128x128xf32>
    %61 = vector.shape_cast %60 : vector<1x128x128xf32> to vector<128x128xf32>
    %cst_26 = arith.constant dense<0.000000e+00> : vector<16x128xf32>
    %62 = tpu.matmul %48, %61, %cst_26 {dimension_numbers = #tpu.dot_dimension_numbers<[1], [0], [0], [1], [0, 0, 1, 1], [], []>} : vector<16x128xf32>, vector<128x128xf32>, vector<16x128xf32> -> vector<16x128xf32>
    %63 = arith.addf %59, %62 : vector<16x128xf32>
    %cst_27 = arith.constant 0.000000e+00 : f32
    %64 = vector.broadcast %cst_27 : f32 to vector<16x128xf32>
    %65 = arith.maximumf %63, %64 : vector<16x128xf32>
    %c1_i32_28 = arith.constant 1 : i32
    %66 = tpu.dynamic_rotate %65 by %c1_i32_28 dim 0 : vector<16x128xf32>, i32 -> vector<16x128xf32>
    %cst_29 = arith.constant 0.000000e+00 : f32
    %67 = vector.shape_cast %20 : vector<16x1xi1> to vector<16x1xi1>
    %68 = vector.broadcast %67 : vector<16x1xi1> to vector<16x128xi1>
    %69 = vector.broadcast %cst_29 : f32 to vector<16x128xf32>
    %70 = arith.select %68, %66, %69 : vector<16x128xi1>, vector<16x128xf32>
    %c15_i32_30 = arith.constant 15 : i32
    %71 = tpu.dynamic_rotate %65 by %c15_i32_30 dim 0 : vector<16x128xf32>, i32 -> vector<16x128xf32>
    %cst_31 = arith.constant 0.000000e+00 : f32
    %72 = vector.shape_cast %38 : vector<16x1xi1> to vector<16x1xi1>
    %73 = vector.broadcast %72 : vector<16x1xi1> to vector<16x128xi1>
    %74 = vector.broadcast %cst_31 : f32 to vector<16x128xf32>
    %75 = arith.select %73, %71, %74 : vector<16x128xi1>, vector<16x128xf32>
    %c0_32 = arith.constant 0 : index
    %c0_33 = arith.constant 0 : index
    %76 = vector.load %arg5[%c0_32, %c0_33] : memref<1x128xf32, #tpu.memory_space<vmem>>, vector<1x128xf32>
    %77 = vector.shape_cast %76 : vector<1x128xf32> to vector<1x128xf32>
    %78 = vector.broadcast %77 : vector<1x128xf32> to vector<16x128xf32>
    %c0_34 = arith.constant 0 : index
    %c0_35 = arith.constant 0 : index
    %c0_36 = arith.constant 0 : index
    %79 = vector.load %arg4[%c0_34, %c0_35, %c0_36] : memref<3x128x128xf32, #tpu.memory_space<vmem>>, vector<1x128x128xf32>
    %80 = vector.shape_cast %79 : vector<1x128x128xf32> to vector<128x128xf32>
    %cst_37 = arith.constant dense<0.000000e+00> : vector<16x128xf32>
    %81 = tpu.matmul %70, %80, %cst_37 {dimension_numbers = #tpu.dot_dimension_numbers<[1], [0], [0], [1], [0, 0, 1, 1], [], []>} : vector<16x128xf32>, vector<128x128xf32>, vector<16x128xf32> -> vector<16x128xf32>
    %82 = arith.addf %78, %81 : vector<16x128xf32>
    %c1_38 = arith.constant 1 : index
    %c0_39 = arith.constant 0 : index
    %c0_40 = arith.constant 0 : index
    %83 = vector.load %arg4[%c1_38, %c0_39, %c0_40] : memref<3x128x128xf32, #tpu.memory_space<vmem>>, vector<1x128x128xf32>
    %84 = vector.shape_cast %83 : vector<1x128x128xf32> to vector<128x128xf32>
    %cst_41 = arith.constant dense<0.000000e+00> : vector<16x128xf32>
    %85 = tpu.matmul %65, %84, %cst_41 {dimension_numbers = #tpu.dot_dimension_numbers<[1], [0], [0], [1], [0, 0, 1, 1], [], []>} : vector<16x128xf32>, vector<128x128xf32>, vector<16x128xf32> -> vector<16x128xf32>
    %86 = arith.addf %82, %85 : vector<16x128xf32>
    %c2_42 = arith.constant 2 : index
    %c0_43 = arith.constant 0 : index
    %c0_44 = arith.constant 0 : index
    %87 = vector.load %arg4[%c2_42, %c0_43, %c0_44] : memref<3x128x128xf32, #tpu.memory_space<vmem>>, vector<1x128x128xf32>
    %88 = vector.shape_cast %87 : vector<1x128x128xf32> to vector<128x128xf32>
    %cst_45 = arith.constant dense<0.000000e+00> : vector<16x128xf32>
    %89 = tpu.matmul %75, %88, %cst_45 {dimension_numbers = #tpu.dot_dimension_numbers<[1], [0], [0], [1], [0, 0, 1, 1], [], []>} : vector<16x128xf32>, vector<128x128xf32>, vector<16x128xf32> -> vector<16x128xf32>
    %90 = arith.addf %86, %89 : vector<16x128xf32>
    %cst_46 = arith.constant 0.000000e+00 : f32
    %91 = vector.broadcast %cst_46 : f32 to vector<16x128xf32>
    %92 = arith.maximumf %90, %91 : vector<16x128xf32>
    %93 = vector.shape_cast %92 : vector<16x128xf32> to vector<1x16x128xf32>
    %c0_47 = arith.constant 0 : index
    %c0_48 = arith.constant 0 : index
    %c0_49 = arith.constant 0 : index
    %94 = vector.load %arg6[%c0_47, %c0_48, %c0_49] : memref<1x16x128xf32, #tpu.memory_space<vmem>>, vector<1x16x128xf32>
    tpu.vector_store %arg6[%c0_47, %c0_48, %c0_49], %93 {strides = array<i32>} : memref<1x16x128xf32, #tpu.memory_space<vmem>>, vector<1x16x128xf32>,
    return
  }
  func.func @transform_0(%arg0: i32) -> (i32, i32, i32) {
    %c0_i32 = arith.constant 0 : i32
    %c0_i32_0 = arith.constant 0 : i32
    %c0_i32_1 = arith.constant 0 : i32
    return %arg0, %c0_i32, %c0_i32_0 : i32, i32, i32
  }
  func.func @transform_1(%arg0: i32) -> (i32, i32, i32) {
    %c0_i32 = arith.constant 0 : i32
    %c0_i32_0 = arith.constant 0 : i32
    %c0_i32_1 = arith.constant 0 : i32
    %c0_i32_2 = arith.constant 0 : i32
    return %c0_i32, %c0_i32_0, %c0_i32_1 : i32, i32, i32
  }
  func.func @transform_2(%arg0: i32) -> (i32, i32) {
    %c0_i32 = arith.constant 0 : i32
    %c0_i32_0 = arith.constant 0 : i32
    %c0_i32_1 = arith.constant 0 : i32
    return %c0_i32, %c0_i32_0 : i32, i32
  }
  func.func @transform_3(%arg0: i32) -> (i32, i32, i32) {
    %c0_i32 = arith.constant 0 : i32
    %c0_i32_0 = arith.constant 0 : i32
    %c0_i32_1 = arith.constant 0 : i32
    %c0_i32_2 = arith.constant 0 : i32
    return %c0_i32, %c0_i32_0, %c0_i32_1 : i32, i32, i32
  }
  func.func @transform_4(%arg0: i32) -> (i32, i32) {
    %c0_i32 = arith.constant 0 : i32
    %c0_i32_0 = arith.constant 0 : i32
    %c0_i32_1 = arith.constant 0 : i32
    return %c0_i32, %c0_i32_0 : i32, i32
  }
  func.func @transform_5(%arg0: i32) -> (i32, i32, i32) {
    %c0_i32 = arith.constant 0 : i32
    %c0_i32_0 = arith.constant 0 : i32
    %c0_i32_1 = arith.constant 0 : i32
    return %arg0, %c0_i32, %c0_i32_0 : i32, i32, i32
  }
}

</mosaic_0001>

<bundles_post_ra>
// kernel: tpu_custom_call.1
= control target key start
LH: loop header
LB: loop body
LE: loop exit
PB: predicated region body
PF: predicated region fallthrough
CT: control target
= control target key end

     0   :  { %10 = vsyncpa [#allocation3], 0  ;;  %s1902_s0 = inlined_call_operand.hbm [shape: f32[2,16,128], index: 0, kind: input, shape index: {}]   ;;  %s1903_s1 = inlined_call_operand.hbm [shape: f32[3,128,128], index: 1, kind: input, shape index: {}]   ;;  %s1904_s2 = inlined_call_operand.vmem [shape: f32[1,128], index: 2, kind: input, shape index: {}]   ;;  %s1905_s3 = inlined_call_operand.hbm [shape: f32[3,128,128], index: 3, kind: input, shape index: {}]   ;;  %s1906_s4 = inlined_call_operand.vmem [shape: f32[1,128], index: 4, kind: input, shape index: {}]   ;;  %s1907_s5 = inlined_call_operand.hbm [shape: f32[2,16,128], index: 5, kind: output, shape index: {}]  }
   0x1   :  { %12 = vsyncpa [#allocation3 + $0x1], 0 }
   0x2   :  { %13 = vsyncpa [#allocation6], 0 }
   0x3   :  { %14 = vsyncpa [#allocation4], 0 }
   0x4   :  { %16 = vsyncpa [#allocation4 + $0x1], 0  ;;  %s1630_s18 = smov 0   ;;  %s1632_s19 = smov 0  }
   0x5   :  { %s1634_s20 = smov 0   ;;  %s1636_s21 = smov 0  }
   0x6 LB: > { %s1651_s22 = sadd.s32 4294967295, %s1590_s21   ;;  %s1027_s23 = sadd.s32 4294967294, %s1590_s21   ;;  %s1590_s21 = sphi %s1636_s21, %s1934_s21   ;;  %s1586_s20 = sphi %s1634_s20, %s1933_s20   ;;  %s1582_s19 = sphi %s1632_s19, %s1932_s19   ;;  %s1578_s18 = sphi %s1630_s18, %s1931_s18  }
   0x7   : > { %p42_p0 = scmp.ne.s32.totalorder %s1582_s19, %s1578_s18  ;;  %p1908_p1 = scmp.eq.s32.totalorder %s1651_s22, 0 }
   0x8   : > { %p150_p2 = scmp.eq.s32.totalorder %s1651_s22, 1  ;;  %p156_p3 = scmp.eq.s32.totalorder %s1027_s23, 1 }
   0x9   : > { %p1660_p4 = por %p1908_p1, %p42_p0  ;;  %p1028_p5 = scmp.ge.s32.totalorder %s1590_s21, 1 }
   0xa   : > { %p1665_p6 = por %p156_p3, %p42_p0  ;;  %p163_p7 = scmp.lt.s32.totalorder %s1590_s21, 3 }
   0xb   : > { %s1913_s24 = scalar_select %p1660_p4, 1, 0 }
   0xc   : > { %s1914_s25 = scalar_select %p1665_p6, 1, 0 }
   0xd   : > { %p1670_p8 = pnand %p1028_p5, %p163_p7  ;;  %s1592_s27 = smov [#allocation5]  }
   0xe   : > { %s175_s28 = sshll.u32 %s1592_s27, 4  ;;  %s1593_s30 = smov [#allocation7]   ;;  %s176_s28 = int_to_ptr.vmem [resolvable:$true] %s175_s28 }
   0xf   : > { %s1915_s26 = scalar_select %p1670_p8, 1, 0 }
  0x10   : > { %p1383_p9 = pneg %p1670_p8  ;;  %s191_s6 = sshll.u32 %s1593_s30, 4  ;;  %s192_s6 = int_to_ptr.vmem [resolvable:$true] %s191_s6 }
  0x11   : > { %s1453_s7 = scalar_lea.vmem %s176_s28, 6144  ;;  %p1461_p5 = scmp.lt.s32.totalorder %s176_s28, %s176_s28 }
  0x12   : > { %p1679_p11 = pnand %p1383_p9, %p1908_p1  ;;  %p1454_p13 = scmp.ne.s32.totalorder %s176_s28, %s1453_s7 }
  0x13   : > { %p1462_p7 = scmp.lt.s32.totalorder %s1453_s7, %s1453_s7 }
  0x14   : > { %p1444_p12 = pneg %p1679_p11 }
  0x15   : > { %p1463_p10 = por %p1462_p7, %p1461_p5 }
  0x16   : > { %p1456_p0 = pnand %p1454_p13, %p1444_p12 }
  0x18   : > { %p1457_p3 = pneg %p1456_p0 }
  0x1a   : > { %p1464_p9 = pnand %p1463_p10, %p1457_p3 }
  0x1c   : > { %1467 = shalt.err (!%p1464_p9)
}
  0x1d   : > { %s1909_s8 = smov 128   ;;  %s1595_s9 = smov 8  }
  0x1e   : > { %1386 = dma.hbm_to_vmem [thread:$0]  (!%p1679_p11), %s1903_s1, 6144, %s176_s28, [#allocation6], %s1909_s8, %s1909_s8, %s1595_s9  }
  0x1f   : > { %s1479_s12 = scalar_lea.vmem %s192_s6, 6144  ;;  %p1487_p10 = scmp.lt.s32.totalorder %s192_s6, %s192_s6 }
  0x20   : > { %p1480_p13 = scmp.ne.s32.totalorder %s192_s6, %s1479_s12  ;;  %p1488_p3 = scmp.lt.s32.totalorder %s1479_s12, %s1479_s12 }
  0x22   : > { %p1482_p0 = pnand %p1480_p13, %p1444_p12  ;;  %p1489_p7 = por %p1488_p3, %p1487_p10 }
  0x24   : > { %p1483_p5 = pneg %p1482_p0 }
  0x26   : > { %p1490_p9 = pnand %p1489_p7, %p1483_p5 }
  0x28   : > { %1493 = shalt.err (!%p1490_p9)
}
  0x29   : > { %1389 = dma.hbm_to_vmem [thread:$0]  (!%p1679_p11), %s1905_s3, 6144, %s192_s6, [#allocation6], %s1909_s8, %s1909_s8, %s1595_s9  }
  0x2a   : > { %s1708_s15 = sadd.s32 1, %s1590_s21   ;;  %s29_s16 = sadd.s32 1, %s1586_s20 }
  0x2b   : > { %s26_s17 = ssub.s32 %s1590_s21, %s1708_s15  ;;  %p36_p12 = scmp.ne.s32.totalorder %s1586_s20, %s1582_s19 }
  0x2c   : > { %p27_p13 = scmp.eq.s32.totalorder %s26_s17, 0  ;;  %p37_p0 = scmp.eq.s32.totalorder %s1590_s21, 0 }
  0x2d   : > { %p1718_p5 = por %p150_p2, %p36_p12  ;;  %p1400_p10 = scmp.lt.s32.totalorder %s1590_s21, 2 }
  0x2e   : > { %s1724_s27 = scalar_select %p27_p13, %s1586_s20, %s29_s16  }
  0x2f   : > { %s1917_s23 = scalar_select %p1718_p5, 1, 0 }
  0x30   : > { %p38_p3 = por %p37_p0, %p36_p12  ;;  %s208_s28 = sand.u32 1, %s1586_s20  }
  0x31   : > { %s1032_s29 = sshll.u32 %s208_s28, 4  ;;  %s1051_s30 = sshll.u32 %s1590_s21, 8 }
  0x32   : > { %s1731_s10 = scalar_lea.hbm %s1902_s0, %s1051_s30  ;;  %s212_s11 = scalar_lea.vmem [#allocation2], %s1032_s29 }
  0x33   : > { %s219_s12 = sshll.u32 %s212_s11, 4  ;;  %p1735_p2 = pnand %p1400_p10, %p38_p3  ;;  %s1733_s12 = int_to_ptr.vmem [resolvable:$true] %s219_s12 }
  0x34   : > { %s1739_s14 = scalar_lea.sflag [#allocation3], %s208_s28  ;;  %s1494_s16 = scalar_lea.hbm %s1731_s10, 256 }
  0x35   : > { %p1495_p11 = scmp.ne.s32.totalorder %s1731_s10, %s1494_s16  ;;  %p1496_p7 = pneg %p1735_p2 }
  0x36   : > { %s1499_s29 = scalar_lea.hbm %s1902_s0, 512  ;;  %p1500_p13 = scmp.lt.s32.totalorder %s1731_s10, %s1902_s0 }
  0x37   : > { %p1497_p9 = pnand %p1496_p7, %p1495_p11  ;;  %p1501_p0 = scmp.lt.s32.totalorder %s1499_s29, %s1494_s16 }
  0x39   : > { %p1498_p12 = pneg %p1497_p9  ;;  %p1502_p10 = por %p1501_p0, %p1500_p13 }
  0x3b   : > { %p1503_p3 = pnand %p1502_p10, %p1498_p12 }
  0x3d   : > { %1506 = shalt.err (!%p1503_p3)
}
  0x3e   : > { %s1507_s28 = scalar_lea.vmem %s1733_s12, 256  ;;  %s1596_s11 = smov [#allocation2]  }
  0x3f   : > { %p1508_p1 = scmp.ne.s32.totalorder %s1733_s12, %s1507_s28  ;;  %s1512_s8 = sshll.u32 %s1596_s11, 4  ;;  %s1513_s8 = int_to_ptr.vmem [resolvable:$false] %s1512_s8 }
  0x40   : > { %s1514_s17 = scalar_lea.vmem %s1513_s8, 512  ;;  %p1515_p9 = scmp.lt.s32.totalorder %s1733_s12, %s1513_s8 }
  0x41   : > { %p1510_p6 = pnand %p1508_p1, %p1496_p7  ;;  %p1516_p5 = scmp.lt.s32.totalorder %s1514_s17, %s1507_s28 }
  0x43   : > { %p1511_p11 = pneg %p1510_p6  ;;  %p1517_p4 = por %p1516_p5, %p1515_p9 }
  0x45   : > { %p1518_p8 = pnand %p1517_p4, %p1511_p11 }
  0x47   : > { %1521 = shalt.err (!%p1518_p8)
}
  0x48   : > { %s1919_s16 = smov 128   ;;  %p1920_p1 = scmp.ne.s32.totalorder %s1915_s26, 0 }
  0x49   : > { %1393 = dma.hbm_to_vmem [thread:$0]  (!%p1735_p2), %s1731_s10, 256, %s1733_s12, %s1739_s14, %s1919_s16, %s1919_s16, %s1595_s9  }
  0x4a   : > { %231 = sbr.rel (%p1920_p1) target bundleno = 597 (0x255), region = 40  ;;  %s1766_s30 = sand.u32 (!%p1920_p1), 1, %s1582_s19  }
  0x4b   : > { %s1036_s8 = sshll.u32 (!%p1920_p1), %s1766_s30, 4  ;;  %s234_s29 = scalar_lea.sflag (!%p1920_p1), [#allocation3], %s1766_s30 }
  0x4c   : > { %s1772_s13 = scalar_lea.vmem (!%p1920_p1), [#allocation2], %s1036_s8  ;;  %p1921_p4 = scmp.ne.s32.totalorder (!%p1920_p1), %s1913_s24, 0 }
  0x4f   : > { %1565 = dma.done.wait (%p1921_p4), %s234_s29, 256  }
  0x50   : > { %1567 = vsyncadd (%p1921_p4), %s234_s29, 4294967040  ;;  %p1922_p6 = scmp.eq.s32.totalorder %s1651_s22, 0 }
  0x52   : > { %1569 = dma.done.wait (%p1922_p6), [#allocation6], 12288   ;;  %p1923_p8 = pmov %p1922_p6 }
  0x53   : > { %v349_v0 = vld [vmem:[#allocation5 + $0x78] sm:$0xff]  ;;  %v348_v1 = vld [vmem:[#allocation5 + $0x70] sm:$0xff]  ;;  %v347_v4 = vld [vmem:[#allocation5 + $0x68] sm:$0xff]  ;;  %v274_v18 = vlaneseq  ;;  %s271_s12 = scalar_lea.vmem [#allocation8], %s1036_s8  ;;  %s1052_s6 = sshll.u32 %s1651_s22, 8 }
  0x54   : > { %1571 = vsyncadd (%p1923_p8), [#allocation6], 4294955008  ;;  %v443_v2 = vld [vmem:[#allocation5 + $0xf8] sm:$0xff]  ;;  %1161 = vmatprep.subr.mxu0 %v349_v0  ;;  %v442_v3 = vld [vmem:[#allocation5 + $0xf0] sm:$0xff]  ;;  %s935_s14 = sshll.u32 %s271_s12, 4  ;;  %s1859_s11 = scalar_lea.hbm %s1907_s5, %s1052_s6  ;;  %s1854_s14 = int_to_ptr.vmem [resolvable:$true] %s935_s14 }
  0x55   : > { %1196 = vmatprep.subr.mxu1 %v443_v2  ;;  %1162 = vmatpush3.msra.mxu0 %v349_v0  ;;  %v441_v5 = vld [vmem:[#allocation5 + $0xe8] sm:$0xff]  ;;  %v346_v6 = vld [vmem:[#allocation5 + $0x60] sm:$0xff]  ;;  %v345_v8 = vld [vmem:[#allocation5 + $0x58] sm:$0xff]  ;;  %v1782_v24 = vshrl.u32 %v274_v18, 7  ;;  %s922_s17 = scalar_lea.sflag [#allocation4], %s1766_s30  ;;  %s1522_s16 = scalar_lea.vmem %s1854_s14, 256 }
  0x56   : > { %1197 = vmatpush3.msra.mxu1 %v443_v2  ;;  %1163 = vmatprep.subr.mxu0 %v348_v1  ;;  %v440_v7 = vld [vmem:[#allocation5 + $0xe0] sm:$0xff]  ;;  %v439_v9 = vld [vmem:[#allocation5 + $0xd8] sm:$0xff]  ;;  %v344_v10 = vld [vmem:[#allocation5 + $0x50] sm:$0xff]  ;;  %p1523_p5 = scmp.ne.s32.totalorder %s1854_s14, %s1522_s16  ;;  %p1928_p2 = scmp.ne.s32.totalorder %s1917_s23, 0 }
  0x57   : > { %1198 = vmatprep.subr.mxu1 %v442_v3  ;;  %1164 = vmatpush3.msra.mxu0 %v348_v1  ;;  %v438_v11 = vld [vmem:[#allocation5 + $0xd0] sm:$0xff]  ;;  %v343_v12 = vld [vmem:[#allocation5 + $0x48] sm:$0xff]  ;;  %v342_v14 = vld [vmem:[#allocation5 + $0x40] sm:$0xff]  ;;  %v281_v30 = vand.u32 15, %v1782_v24  ;;  %vm307_vm0 = vcmp.lt.s32.totalorder %v1782_v24, 1  ;;  %vm318_vm2 = vcmp.lt.s32.totalorder %v1782_v24, 7 }
  0x58   : > { %1199 = vmatpush3.msra.mxu1 %v442_v3  ;;  %1165 = vmatprep.subr.mxu0 %v347_v4  ;;  %v437_v13 = vld [vmem:[#allocation5 + $0xc8] sm:$0xff]  ;;  %v436_v15 = vld [vmem:[#allocation5 + $0xc0] sm:$0xff]  ;;  %v341_v16 = vld [vmem:[#allocation5 + $0x38] sm:$0xff]  ;;  %v276_v58 = vadd.s32 8, %v1782_v24  ;;  %p1524_p7 = pnand %p1523_p5, %p1928_p2  ;;  %s1597_s22 = smov [#allocation8]  }
  0x59   : > { %1200 = vmatprep.subr.mxu1 %v441_v5  ;;  %1166 = vmatpush3.msra.mxu0 %v347_v4  ;;  %v435_v17 = vld [vmem:[#allocation5 + $0xb8] sm:$0xff]  ;;  %v340_v19 = vld [vmem:[#allocation5 + $0x30] sm:$0xff]  ;;  %v339_v21 = vld [vmem:[#allocation5 + $0x28] sm:$0xff]  ;;  %vm1794_vm1 = vcmp.ne.s32.totalorder %v281_v30, 0  ;;  %s1526_s8 = sshll.u32 %s1597_s22, 4  ;;  %s1527_s8 = int_to_ptr.vmem [resolvable:$false] %s1526_s8 }
  0x5a   : > { %1201 = vmatpush3.msra.mxu1 %v441_v5  ;;  %1167 = vmatprep.subr.mxu0 %v346_v6  ;;  %v434_v20 = vld [vmem:[#allocation5 + $0xb0] sm:$0xff]  ;;  %v433_v22 = vld [vmem:[#allocation5 + $0xa8] sm:$0xff]  ;;  %v338_v23 = vld [vmem:[#allocation5 + $0x20] sm:$0xff]  ;;  %v288_v61 = vand.u32 15, %v276_v58  ;;  %p1525_p12 = pneg %p1524_p7  ;;  %s1528_s29 = scalar_lea.vmem %s1527_s8, 512 }
  0x5b   : > { %1202 = vmatprep.subr.mxu1 %v440_v7  ;;  %1168 = vmatpush3.msra.mxu0 %v346_v6  ;;  %v432_v25 = vld [vmem:[#allocation5 + $0xa0] sm:$0xff]  ;;  %v1788_v27 = vld [vmem:[%s1772_s13 + $0x8] sm:$0xff]  ;;  %v336_v33 = vld [vmem:[#allocation5 + $0x10] sm:$0xff]  ;;  %p1529_p13 = scmp.lt.s32.totalorder %s1854_s14, %s1527_s8  ;;  %p1530_p0 = scmp.lt.s32.totalorder %s1528_s29, %s1522_s16 }
  0x5c   : > { %1203 = vmatpush3.msra.mxu1 %v440_v7  ;;  %1169 = vmatprep.subr.mxu0 %v345_v8  ;;  %v1785_v26 = vld [vmem:[%s1772_s13] sm:$0xff]  ;;  %v337_v28 = vld [vmem:[#allocation5 + $0x18] sm:$0xff]  ;;  %v306_v32 = vrot.slane %v1788_v27, 7  ;;  %v335_v35 = vld [vmem:[#allocation5 + $0x8] sm:$0xff]  ;;  %v317_v42 = vrot.slane %v1788_v27, 1  ;;  %vm1816_vm3 = vcmp.ne.s32.totalorder %v288_v61, 15 }
  0x5d   : > { %1204 = vmatprep.subr.mxu1 %v439_v9  ;;  %1170 = vmatpush3.msra.mxu0 %v345_v8  ;;  %v431_v29 = vld [vmem:[#allocation5 + $0x98] sm:$0xff]  ;;  %v305_v31 = vrot.slane %v1785_v26, 7  ;;  %v430_v34 = vld [vmem:[#allocation5 + $0x90] sm:$0xff]  ;;  %v429_v36 = vld [vmem:[#allocation5 + $0x88] sm:$0xff]  ;;  %v316_v41 = vrot.slane %v1785_v26, 1  ;;  %p1531_p10 = por %p1530_p0, %p1529_p13 }
  0x5e   : > { %1205 = vmatpush3.msra.mxu1 %v439_v9  ;;  %1171 = vmatprep.subr.mxu0 %v344_v10  ;;  %v334_v39 = vld [vmem:[#allocation5] sm:$0xff]  ;;  %v537_v44 = vld [vmem:[#allocation5 + $0x178] sm:$0xff]  ;;  %v536_v45 = vld [vmem:[#allocation5 + $0x170] sm:$0xff] }
  0x5f   : > { %1206 = vmatprep.subr.mxu1 %v438_v11  ;;  %1172 = vmatpush3.msra.mxu0 %v344_v10  ;;  %v309_v38 = vsel %vm307_vm0, %v306_v32, %v305_v31  ;;  %v428_v40 = vld [vmem:[#allocation5 + $0x80] sm:$0xff]  ;;  %v308_v43 = vsel %vm307_vm0, %v305_v31, %v306_v32  ;;  %v319_v46 = vsel %vm318_vm2, %v316_v41, %v317_v42  ;;  %v535_v47 = vld [vmem:[#allocation5 + $0x168] sm:$0xff]  ;;  %v533_v49 = vld [vmem:[#allocation5 + $0x158] sm:$0xff]  ;;  %p1532_p3 = pnand %p1531_p10, %p1525_p12 }
  0x60   : > { %1207 = vmatpush3.msra.mxu1 %v438_v11  ;;  %1173 = vmatprep.subr.mxu0 %v343_v12  ;;  %v534_v48 = vld [vmem:[#allocation5 + $0x160] sm:$0xff]  ;;  %v532_v50 = vld [vmem:[#allocation5 + $0x150] sm:$0xff]  ;;  %v531_v51 = vld [vmem:[#allocation5 + $0x148] sm:$0xff]  ;;  %v320_v0 = vsel %vm318_vm2, %v317_v42, %v316_v41 }
  0x61   : > { %1208 = vmatprep.subr.mxu1 %v437_v13  ;;  %1174 = vmatpush3.msra.mxu0 %v343_v12  ;;  %v530_v52 = vld [vmem:[#allocation5 + $0x140] sm:$0xff]  ;;  %v529_v53 = vld [vmem:[#allocation5 + $0x138] sm:$0xff]  ;;  %v528_v54 = vld [vmem:[#allocation5 + $0x130] sm:$0xff] }
  0x62   : > { %1209 = vmatpush3.msra.mxu1 %v437_v13  ;;  %1175 = vmatprep.subr.mxu0 %v342_v14  ;;  %v527_v55 = vld [vmem:[#allocation5 + $0x128] sm:$0xff]  ;;  %v526_v56 = vld [vmem:[#allocation5 + $0x120] sm:$0xff]  ;;  %v525_v57 = vld [vmem:[#allocation5 + $0x118] sm:$0xff] }
  0x63   : > { %1210 = vmatprep.subr.mxu1 %v436_v15  ;;  %1176 = vmatpush3.msra.mxu0 %v342_v14  ;;  %v524_v59 = vld [vmem:[#allocation5 + $0x110] sm:$0xff]  ;;  %v523_v60 = vld [vmem:[#allocation5 + $0x108] sm:$0xff]  ;;  %v522_v62 = vld [vmem:[#allocation5 + $0x100] sm:$0xff] }
  0x64   : > { %1211 = vmatpush3.msra.mxu1 %v436_v15  ;;  %1177 = vmatprep.subr.mxu0 %v341_v16  ;;  %v745_v1 = vld [vmem:[#allocation7 + $0xf8] sm:$0xff]  ;;  %v744_v3 = vld [vmem:[#allocation7 + $0xf0] sm:$0xff]  ;;  %v743_v5 = vld [vmem:[#allocation7 + $0xe8] sm:$0xff] }
  0x65   : > { %1212 = vmatprep.subr.mxu1 %v435_v17  ;;  %1178 = vmatpush3.msra.mxu0 %v341_v16  ;;  %v651_v2 = vld [vmem:[#allocation7 + $0x78] sm:$0xff]  ;;  %v650_v4 = vld [vmem:[#allocation7 + $0x70] sm:$0xff]  ;;  %v649_v6 = vld [vmem:[#allocation7 + $0x68] sm:$0xff] }
  0x66   : > { %1213 = vmatpush3.msra.mxu1 %v435_v17  ;;  %1179 = vmatprep.subr.mxu0 %v340_v19  ;;  %v742_v7 = vld [vmem:[#allocation7 + $0xe0] sm:$0xff]  ;;  %v741_v9 = vld [vmem:[#allocation7 + $0xd8] sm:$0xff]  ;;  %v740_v11 = vld [vmem:[#allocation7 + $0xd0] sm:$0xff] }
  0x67   : > { %1214 = vmatprep.subr.mxu1 %v434_v20  ;;  %1180 = vmatpush3.msra.mxu0 %v340_v19  ;;  %v648_v8 = vld [vmem:[#allocation7 + $0x60] sm:$0xff]  ;;  %v647_v10 = vld [vmem:[#allocation7 + $0x58] sm:$0xff]  ;;  %v646_v12 = vld [vmem:[#allocation7 + $0x50] sm:$0xff] }
  0x68   : > { %1215 = vmatpush3.msra.mxu1 %v434_v20  ;;  %1181 = vmatprep.subr.mxu0 %v339_v21  ;;  %v739_v13 = vld [vmem:[#allocation7 + $0xc8] sm:$0xff]  ;;  %v738_v15 = vld [vmem:[#allocation7 + $0xc0] sm:$0xff]  ;;  %v737_v17 = vld [vmem:[#allocation7 + $0xb8] sm:$0xff] }
  0x69   : > { %1216 = vmatprep.subr.mxu1 %v433_v22  ;;  %1182 = vmatpush3.msra.mxu0 %v339_v21  ;;  %v645_v14 = vld [vmem:[#allocation7 + $0x48] sm:$0xff]  ;;  %v644_v16 = vld [vmem:[#allocation7 + $0x40] sm:$0xff]  ;;  %v643_v18 = vld [vmem:[#allocation7 + $0x38] sm:$0xff] }
  0x6a   : > { %1217 = vmatpush3.msra.mxu1 %v433_v22  ;;  %1183 = vmatprep.subr.mxu0 %v338_v23  ;;  %v736_v19 = vld [vmem:[#allocation7 + $0xb0] sm:$0xff]  ;;  %v735_v21 = vld [vmem:[#allocation7 + $0xa8] sm:$0xff]  ;;  %v730_v32 = vld [vmem:[#allocation7 + $0x80] sm:$0xff] }
  0x6b   : > { %1218 = vmatprep.subr.mxu1 %v432_v25  ;;  %1184 = vmatpush3.msra.mxu0 %v338_v23  ;;  %v642_v20 = vld [vmem:[#allocation7 + $0x30] sm:$0xff]  ;;  %v641_v22 = vld [vmem:[#allocation7 + $0x28] sm:$0xff]  ;;  %v734_v23 = vld [vmem:[#allocation7 + $0xa0] sm:$0xff] }
  0x6c   : > { %1219 = vmatpush3.msra.mxu1 %v432_v25  ;;  %1185 = vmatprep.subr.mxu0 %v337_v28  ;;  %v640_v25 = vld [vmem:[#allocation7 + $0x20] sm:$0xff]  ;;  %v731_v30 = vld [vmem:[#allocation7 + $0x88] sm:$0xff]  ;;  %v835_v61 = vld [vmem:[#allocation7 + $0x158] sm:$0xff] }
  0x6d   : > { %1220 = vmatprep.subr.mxu1 %v431_v29  ;;  %1186 = vmatpush3.msra.mxu0 %v337_v28  ;;  %v732_v28 = vld [vmem:[#allocation7 + $0x90] sm:$0xff]  ;;  %v637_v31 = vld [vmem:[#allocation7 + $0x8] sm:$0xff] }
  0x6e   : > { %1221 = vmatpush3.msra.mxu1 %v431_v29  ;;  %1187 = vmatprep.subr.mxu0 %v336_v33  ;;  %v638_v29 = vld [vmem:[#allocation7 + $0x10] sm:$0xff]  ;;  %v833_v37 = vld [vmem:[#allocation7 + $0x148] sm:$0xff] }
  0x6f   : > { %1222 = vmatprep.subr.mxu1 %v430_v34  ;;  %1188 = vmatpush3.msra.mxu0 %v336_v33  ;;  %v636_v33 = vld [vmem:[#allocation7] sm:$0xff] }
  0x70   : > { %1223 = vmatpush3.msra.mxu1 %v430_v34  ;;  %1189 = vmatprep.subr.mxu0 %v335_v35  ;;  %v839_v34 = vld [vmem:[#allocation7 + $0x178] sm:$0xff] }
  0x71   : > { %1224 = vmatprep.subr.mxu1 %v429_v36  ;;  %1190 = vmatpush3.msra.mxu0 %v335_v35 }
  0x72   : > { %1193 = vmatprep.mubr.msk.f32.mxu0 %vm1794_vm1, %v309_v38  ;;  %1191 = vmatprep.subr.mxu0 %v334_v39 }
  0x73   : > { %1225 = vmatpush3.msra.mxu1 %v429_v36  ;;  %1192 = vmatpush3.msra.mxu0 %v334_v39  ;;  %v1040_v36 = vld [vmem:[%s1904_s2] ss:$0 sm:$0xff] }
  0x74   : > { %1226 = vmatprep.subr.mxu1 %v428_v40  ;;  %1194 = vmatmul.mubr.f32.vlgmr.msra.gmra.mxu0 %v308_v43 }
  0x75   : > { %1231 = vmatprep.subr.mxu0 %v537_v44  ;;  %1227 = vmatpush3.msra.mxu1 %v428_v40 }
  0x76   : > { %1228 = vmatprep.mubr.f32.mxu1 %v1785_v26  ;;  %1232 = vmatpush3.msra.mxu0 %v537_v44  ;;  %v733_v26 = vld [vmem:[#allocation7 + $0x98] sm:$0xff] }
  0x77   : > { %1229 = vmatmul.mubr.f32.vlgmr.msra.gmra.mxu1 %v1788_v27  ;;  %1233 = vmatprep.subr.mxu0 %v536_v45  ;;  %v639_v27 = vld [vmem:[#allocation7 + $0x18] sm:$0xff] }
  0x78   : > { %1263 = vmatprep.mubr.f32.mxu0 %v319_v46  ;;  %1234 = vmatpush3.msra.mxu0 %v536_v45 }
  0x79   : > { %1235 = vmatprep.subr.mxu0 %v535_v47  ;;  %1266 = vmatprep.subr.mxu1 %v651_v2 }
  0x7a   : > { %1236 = vmatpush3.msra.mxu0 %v535_v47  ;;  %1267 = vmatpush3.msra.mxu1 %v651_v2  ;;  %v830_v2 = vld [vmem:[#allocation7 + $0x130] sm:$0xff] }
  0x7b   : > { %1237 = vmatprep.subr.mxu0 %v534_v48  ;;  %1268 = vmatprep.subr.mxu1 %v650_v4 }
  0x7c   : > { %1238 = vmatpush3.msra.mxu0 %v534_v48  ;;  %1269 = vmatpush3.msra.mxu1 %v650_v4  ;;  %v828_v4 = vld [vmem:[#allocation7 + $0x120] sm:$0xff] }
  0x7d   : > { %1239 = vmatprep.subr.mxu0 %v533_v49  ;;  %1270 = vmatprep.subr.mxu1 %v649_v6 }
  0x7e   : > { %1240 = vmatpush3.msra.mxu0 %v533_v49  ;;  %1271 = vmatpush3.msra.mxu1 %v649_v6  ;;  %v826_v6 = vld [vmem:[#allocation7 + $0x110] sm:$0xff] }
  0x7f   : > { %1241 = vmatprep.subr.mxu0 %v532_v50  ;;  %1272 = vmatprep.subr.mxu1 %v648_v8 }
  0x80   : > { %1242 = vmatpush3.msra.mxu0 %v532_v50  ;;  %1273 = vmatpush3.msra.mxu1 %v648_v8  ;;  %v824_v8 = vld [vmem:[#allocation7 + $0x100] sm:$0xff] }
  0x81   : > { %1243 = vmatprep.subr.mxu0 %v531_v51  ;;  %1274 = vmatprep.subr.mxu1 %v647_v10 }
  0x82   : > { %1244 = vmatpush3.msra.mxu0 %v531_v51  ;;  %1275 = vmatpush3.msra.mxu1 %v647_v10 }
  0x83   : > { %1245 = vmatprep.subr.mxu0 %v530_v52  ;;  %1276 = vmatprep.subr.mxu1 %v646_v12 }
  0x84   : > { %1246 = vmatpush3.msra.mxu0 %v530_v52  ;;  %1277 = vmatpush3.msra.mxu1 %v646_v12 }
  0x85   : > { %1247 = vmatprep.subr.mxu0 %v529_v53  ;;  %1278 = vmatprep.subr.mxu1 %v645_v14 }
  0x86   : > { %1248 = vmatpush3.msra.mxu0 %v529_v53  ;;  %1279 = vmatpush3.msra.mxu1 %v645_v14 }
  0x87   : > { %1249 = vmatprep.subr.mxu0 %v528_v54  ;;  %1280 = vmatprep.subr.mxu1 %v644_v16 }
  0x88   : > { %1250 = vmatpush3.msra.mxu0 %v528_v54  ;;  %1281 = vmatpush3.msra.mxu1 %v644_v16 }
  0x89   : > { %1251 = vmatprep.subr.mxu0 %v527_v55  ;;  %1282 = vmatprep.subr.mxu1 %v643_v18 }
  0x8a   : > { %1252 = vmatpush3.msra.mxu0 %v527_v55  ;;  %1283 = vmatpush3.msra.mxu1 %v643_v18 }
  0x8b   : > { %1253 = vmatprep.subr.mxu0 %v526_v56  ;;  %1284 = vmatprep.subr.mxu1 %v642_v20 }
  0x8c   : > { %1254 = vmatpush3.msra.mxu0 %v526_v56  ;;  %1285 = vmatpush3.msra.mxu1 %v642_v20 }
  0x8d   : > { %1255 = vmatprep.subr.mxu0 %v525_v57  ;;  %1286 = vmatprep.subr.mxu1 %v641_v22 }
  0x8e   : > { %1256 = vmatpush3.msra.mxu0 %v525_v57  ;;  %1287 = vmatpush3.msra.mxu1 %v641_v22  ;;  %v838_v57 = vld [vmem:[#allocation7 + $0x170] sm:$0xff] }
  0x8f   : > { %1257 = vmatprep.subr.mxu0 %v524_v59  ;;  %1288 = vmatprep.subr.mxu1 %v640_v25 }
  0x90   : > { %1258 = vmatpush3.msra.mxu0 %v524_v59  ;;  %1289 = vmatpush3.msra.mxu1 %v640_v25  ;;  %v837_v59 = vld [vmem:[#allocation7 + $0x168] sm:$0xff] }
  0x91   : > { %1259 = vmatprep.subr.mxu0 %v523_v60  ;;  %1290 = vmatprep.subr.mxu1 %v639_v27 }
  0x92   : > { %1260 = vmatpush3.msra.mxu0 %v523_v60  ;;  %1291 = vmatpush3.msra.mxu1 %v639_v27  ;;  %v836_v60 = vld [vmem:[#allocation7 + $0x160] sm:$0xff] }
  0x93   : > { %1261 = vmatprep.subr.mxu0 %v522_v62  ;;  %1292 = vmatprep.subr.mxu1 %v638_v29 }
  0x94   : > { %1262 = vmatpush3.msra.mxu0 %v522_v62  ;;  %1293 = vmatpush3.msra.mxu1 %v638_v29  ;;  %v834_v62 = vld [vmem:[#allocation7 + $0x150] sm:$0xff] }
  0x95   : > { %1264 = vmatmul.mubr.msk.f32.vlgmr.msra.gmra.mxu0 %vm1816_vm3, %v320_v0  ;;  %1301 = vmatprep.subr.mxu0 %v745_v1  ;;  %v832_v0 = vld [vmem:[#allocation7 + $0x140] sm:$0xff] }
  0x96   : > { %1302 = vmatpush3.msra.mxu0 %v745_v1  ;;  %1294 = vmatprep.subr.mxu1 %v637_v31  ;;  %v831_v1 = vld [vmem:[#allocation7 + $0x138] sm:$0xff] }
  0x97   : > { %1303 = vmatprep.subr.mxu0 %v744_v3  ;;  %1295 = vmatpush3.msra.mxu1 %v637_v31 }
  0x98   : > { %1304 = vmatpush3.msra.mxu0 %v744_v3  ;;  %1296 = vmatprep.subr.mxu1 %v636_v33  ;;  %v829_v3 = vld [vmem:[#allocation7 + $0x128] sm:$0xff] }
  0x99   : > { %1305 = vmatprep.subr.mxu0 %v743_v5  ;;  %1297 = vmatpush3.msra.mxu1 %v636_v33 }
  0x9a   : > { %1306 = vmatpush3.msra.mxu0 %v743_v5  ;;  %1336 = vmatprep.subr.mxu1 %v839_v34  ;;  %v827_v5 = vld [vmem:[#allocation7 + $0x118] sm:$0xff] }
  0x9b   : > { %1307 = vmatprep.subr.mxu0 %v742_v7 }
  0x9c   : > { %1308 = vmatpush3.msra.mxu0 %v742_v7  ;;  %v825_v7 = vld [vmem:[#allocation7 + $0x108] sm:$0xff] }
  0x9d   : > { %1309 = vmatprep.subr.mxu0 %v741_v9 }
  0x9e   : > { %1310 = vmatpush3.msra.mxu0 %v741_v9 }
  0x9f   : > { %1311 = vmatprep.subr.mxu0 %v740_v11 }
  0xa0   : > { %1312 = vmatpush3.msra.mxu0 %v740_v11  ;;  %v1043_v11 = vld [vmem:[%s1906_s4] ss:$0 sm:$0xff] }
  0xa1   : > { %1313 = vmatprep.subr.mxu0 %v739_v13 }
  0xa2   : > { %1314 = vmatpush3.msra.mxu0 %v739_v13 }
  0xa3   : > { %1315 = vmatprep.subr.mxu0 %v738_v15 }
  0xa4   : > { %1316 = vmatpush3.msra.mxu0 %v738_v15 }
  0xa5   : > { %1317 = vmatprep.subr.mxu0 %v737_v17 }
  0xa6   : > { %1318 = vmatpush3.msra.mxu0 %v737_v17 }
  0xa7   : > { %1319 = vmatprep.subr.mxu0 %v736_v19 }
  0xa8   : > { %1320 = vmatpush3.msra.mxu0 %v736_v19 }
  0xa9   : > { %1321 = vmatprep.subr.mxu0 %v735_v21 }
  0xaa   : > { %1322 = vmatpush3.msra.mxu0 %v735_v21 }
  0xab   : > { %1323 = vmatprep.subr.mxu0 %v734_v23 }
  0xac   : > { %1324 = vmatpush3.msra.mxu0 %v734_v23 }
  0xad   : > { %1325 = vmatprep.subr.mxu0 %v733_v26 }
  0xae   : > { %1326 = vmatpush3.msra.mxu0 %v733_v26 }
  0xaf   : > { %1327 = vmatprep.subr.mxu0 %v732_v28 }
  0xb0   : > { %1328 = vmatpush3.msra.mxu0 %v732_v28 }
  0xb1   : > { %1329 = vmatprep.subr.mxu0 %v731_v30 }
  0xb2   : > { %1330 = vmatpush3.msra.mxu0 %v731_v30 }
  0xb3   : > { %1331 = vmatprep.subr.mxu0 %v730_v32 }
  0xb4   : > { %1332 = vmatpush3.msra.mxu0 %v730_v32 }
 0x134   : > { %v1195_v35 = vpop.f32.mrf.mxu0 }
 0x135   : > { %v426_v40 = vadd.f32 %v1195_v35, %v1040_v36 }
 0x136   : > { %v416_v38 = vpop.f32.mrf.mxu0 }
 0x137   : > { %v1230_v39 = vpop.f32.mrf.mxu1  ;;  %v425_v41 = vadd.f32 %v1040_v36, %v416_v38 }
 0x138   : > { %v520_v43 = vadd.f32 %v1230_v39, %v426_v40 }
 0x139   : > { %v510_v42 = vpop.f32.mrf.mxu1 }
 0x13a   : > { %v519_v45 = vadd.f32 %v510_v42, %v425_v41 }
 0x155   : > { %v1265_v44 = vpop.f32.mrf.mxu0 }
 0x156   : > { %v614_v46 = vadd.f32 %v1265_v44, %v520_v43 }
 0x157   : > { %v604_v47 = vpop.f32.mrf.mxu0 }
 0x158   : > { %v1831_v48 = vmax.f32 %v614_v46, 0.0  ;;  %v613_v49 = vadd.f32 %v604_v47, %v519_v45 }
 0x15a   : > { %v615_v50 = vmax.f32 %v613_v49, 0.0  ;;  %v618_v51 = vrot.slane %v1831_v48, 7  ;;  %v624_v54 = vrot.slane %v1831_v48, 1 }
 0x15c   : > { %v617_v52 = vrot.slane %v615_v50, 7  ;;  %v623_v53 = vrot.slane %v615_v50, 1  ;;  %1333 = vmatprep.mubr.f32.mxu0 %v615_v50 }
 0x15d   : > { %1334 = vmatmul.mubr.f32.vlgmr.msra.gmra.mxu0 %v1831_v48 }
 0x15e   : > { %v620_v55 = vsel %vm307_vm0, %v618_v51, %v617_v52  ;;  %v619_v56 = vsel %vm307_vm0, %v617_v52, %v618_v51  ;;  %v625_v58 = vsel %vm318_vm2, %v623_v53, %v624_v54  ;;  %v626_v9 = vsel %vm318_vm2, %v624_v54, %v623_v53 }
 0x15f   : > { %1298 = vmatprep.mubr.msk.f32.mxu1 %vm1794_vm1, %v620_v55 }
 0x160   : > { %1299 = vmatmul.mubr.f32.vlgmr.msra.gmra.mxu1 %v619_v56 }
 0x161   : > { %1337 = vmatpush3.msra.mxu1 %v839_v34  ;;  %1368 = vmatprep.mubr.f32.mxu1 %v625_v58 }
 0x162   : > { %1338 = vmatprep.subr.mxu1 %v838_v57 }
 0x163   : > { %1339 = vmatpush3.msra.mxu1 %v838_v57 }
 0x164   : > { %1340 = vmatprep.subr.mxu1 %v837_v59 }
 0x165   : > { %1341 = vmatpush3.msra.mxu1 %v837_v59 }
 0x166   : > { %1342 = vmatprep.subr.mxu1 %v836_v60 }
 0x167   : > { %1343 = vmatpush3.msra.mxu1 %v836_v60 }
 0x168   : > { %1344 = vmatprep.subr.mxu1 %v835_v61 }
 0x169   : > { %1345 = vmatpush3.msra.mxu1 %v835_v61 }
 0x16a   : > { %1346 = vmatprep.subr.mxu1 %v834_v62 }
 0x16b   : > { %1347 = vmatpush3.msra.mxu1 %v834_v62 }
 0x16c   : > { %1348 = vmatprep.subr.mxu1 %v833_v37 }
 0x16d   : > { %1349 = vmatpush3.msra.mxu1 %v833_v37 }
 0x16e   : > { %1350 = vmatprep.subr.mxu1 %v832_v0 }
 0x16f   : > { %1351 = vmatpush3.msra.mxu1 %v832_v0 }
 0x170   : > { %1352 = vmatprep.subr.mxu1 %v831_v1 }
 0x171   : > { %1353 = vmatpush3.msra.mxu1 %v831_v1 }
 0x172   : > { %1354 = vmatprep.subr.mxu1 %v830_v2 }
 0x173   : > { %1355 = vmatpush3.msra.mxu1 %v830_v2 }
 0x174   : > { %1356 = vmatprep.subr.mxu1 %v829_v3 }
 0x175   : > { %1357 = vmatpush3.msra.mxu1 %v829_v3 }
 0x176   : > { %1358 = vmatprep.subr.mxu1 %v828_v4 }
 0x177   : > { %1359 = vmatpush3.msra.mxu1 %v828_v4 }
 0x178   : > { %1360 = vmatprep.subr.mxu1 %v827_v5 }
 0x179   : > { %1361 = vmatpush3.msra.mxu1 %v827_v5 }
 0x17a   : > { %1362 = vmatprep.subr.mxu1 %v826_v6 }
 0x17b   : > { %1363 = vmatpush3.msra.mxu1 %v826_v6 }
 0x17c   : > { %1364 = vmatprep.subr.mxu1 %v825_v7 }
 0x17d   : > { %1365 = vmatpush3.msra.mxu1 %v825_v7 }
 0x17e   : > { %1366 = vmatprep.subr.mxu1 %v824_v8 }
 0x17f   : > { %1367 = vmatpush3.msra.mxu1 %v824_v8 }
 0x180   : > { %1369 = vmatmul.mubr.msk.f32.vlgmr.msra.gmra.mxu1 %vm1816_vm3, %v626_v9 }
 0x21d   : > { %v1335_v14 = vpop.f32.mrf.mxu0 }
 0x21f   : > { %v812_v17 = vpop.f32.mrf.mxu0 }
 0x220   : > { %v1300_v10 = vpop.f32.mrf.mxu1 }
 0x221   : > { %v728_v13 = vadd.f32 %v1300_v10, %v1043_v11 }
 0x222   : > { %v718_v12 = vpop.f32.mrf.mxu1 }
 0x223   : > { %v727_v15 = vadd.f32 %v1043_v11, %v718_v12  ;;  %v822_v16 = vadd.f32 %v1335_v14, %v728_v13 }
 0x225   : > { %v821_v63 = vadd.f32 %v812_v17, %v727_v15 }
 0x240   : > { %v1370_v18 = vpop.f32.mrf.mxu1 }
 0x241   : > { %v916_v24 = vadd.f32 %v1370_v18, %v822_v16 }
 0x242   : > { %v906_v19 = vpop.f32.mrf.mxu1 }
 0x243   : > { %v918_v20 = vmax.f32 %v916_v24, 0.0  ;;  %v915_v21 = vadd.f32 %v906_v19, %v821_v63 }
 0x245   : > { %920 = vst [vmem:[%s271_s12 + $0x8] sm:$0xff] %v918_v20  ;;  %v917_v22 = vmax.f32 %v915_v21, 0.0 }
 0x247   : > { %919 = vst [vmem:[%s271_s12] sm:$0xff] %v917_v22 }
 0x248   : > { %1535 = shalt.err (!%p1532_p3)
}
 0x249   : > { %s1536_s13 = scalar_lea.hbm %s1859_s11, 256  ;;  %s1540_s9 = scalar_lea.hbm %s1907_s5, 512 }
 0x24a   : > { %p1537_p11 = scmp.ne.s32.totalorder %s1859_s11, %s1536_s13  ;;  %p1541_p4 = scmp.lt.s32.totalorder %s1859_s11, %s1907_s5 }
 0x24b   : > { %p1542_p6 = scmp.lt.s32.totalorder %s1540_s9, %s1536_s13 }
 0x24c   : > { %p1538_p9 = pnand %p1537_p11, %p1928_p2 }
 0x24d   : > { %p1543_p8 = por %p1542_p6, %p1541_p4 }
 0x24e   : > { %p1539_p1 = pneg %p1538_p9 }
 0x250   : > { %p1544_p5 = pnand %p1543_p8, %p1539_p1 }
 0x252   : > { %1547 = shalt.err (!%p1544_p5)
}
 0x253   : > { %s1598_s6 = smov 128   ;;  %s1599_s7 = smov 8  }
 0x254   : > { %1381 = dma.vmem_to_hbm [thread:$0]  (%p1928_p2), %s1854_s14, 256, %s1859_s11, %s922_s17, %s1598_s6, %s1598_s6, %s1599_s7  }
 0x255 PF: > { %s950_s28 = sand.u32 1, %s1578_s18   ;;  %p1929_p7 = scmp.ne.s32.totalorder %s1914_s25, 0 }
 0x256   : > { %p1930_p12 = scmp.ge.s32.totalorder %s1590_s21, 2  ;;  %s951_s16 = scalar_lea.sflag [#allocation4], %s950_s28 }
 0x258   : > { %p1395_p13 = pnand %p1930_p12, %p1929_p7 }
 0x25a   : > { %p1396_p0 = pneg %p1395_p13 }
 0x25c   : > { %1573 = dma.done.wait (%p1396_p0), %s951_s16, 256  }
 0x25d   : > { %1575 = vsyncadd (%p1396_p0), %s951_s16, 4294967040  ;;  %p19_p10 = scmp.ge.s32.totalorder %s1708_s15, 4   ;;  %s1931_s18 = smov %s1582_s19 }
 0x25e   : > { %s1932_s19 = smov %s1586_s20  ;;  %s1933_s20 = smov %s1724_s27 }
 0x25f   : > { %s1934_s21 = smov %s1708_s15  ;;  %21 = sbr.rel (!%p19_p10) target bundleno = 6 (0x6), region = 97 }
 0x264   :  { %956 = vsyncpa [#allocation3], 1 }
 0x265   :  { %958 = vsyncpa [#allocation3 + $0x1], 1 }
 0x266   :  { %959 = vsyncpa [#allocation6], 1 }
 0x267   :  { %960 = vsyncpa [#allocation4], 1 }
 0x268   :  { %962 = vsyncpa [#allocation4 + $0x1], 1 }

</bundles_post_ra>
